<compile_context>
chip_gen: v5e
topology: v5e:2x2
jax: 0.10.0
libtpu: 0.0.40
codegen_flags: <defaults>
</compile_context>

<pallas_src>
import functools
import math

import jax
import jax.numpy as jnp
from jax.experimental import pallas as pl
from jax.experimental.pallas import tpu as pltpu


# ----------------------------------------------------------------------------
# Hardware-derived constants (graceful fallbacks if the query is unavailable)
# ----------------------------------------------------------------------------
def _query_tpu():
    try:
        return pltpu.get_tpu_info()
    except Exception:
        return None


def _mxu_lane_tile():
    info = _query_tpu()
    if info is not None:
        txt = " ".join(str(getattr(info, a, ""))
                       for a in ("chip_version", "version", "name", "chip_name")).lower()
        if ("v6" in txt) or ("v7" in txt):
            return 256           # 256-wide MXU output tiles on v6e / v7x
    return 128                   # v5e / unknown: 128-wide


def _vmem_limit_bytes():
    cap = None
    info = _query_tpu()
    if info is not None:
        cap = getattr(info, "vmem_capacity_bytes", None)
    if not cap:
        cap = 128 * 1024 * 1024
    # Leave headroom for compiler-internal scratch / retiles (v7x has only 64 MiB / TC).
    return int(max(32 * 1024 * 1024,
                   min(int(cap) - 16 * 1024 * 1024, 100 * 1024 * 1024)))


_LANE_TILE = _mxu_lane_tile()
_VMEM_LIMIT = _vmem_limit_bytes()


# ----------------------------------------------------------------------------
# Canonical flat-padded activation layout helpers (JAX glue, data movement only)
# ----------------------------------------------------------------------------
def _padded_width(W):
    return ((W + 2 + 7) // 8) * 8          # sublane-aligned padded row width


def to_canonical(x_nhwc):
    N, H, W, C = x_nhwc.shape
    Wp = _padded_width(W)
    xp = jnp.pad(x_nhwc, ((0, 0), (1, 1), (1, Wp - W - 1), (0, 0)))
    return xp.reshape(N, (H + 2) * Wp, C)


def downsample_canonical(x_c, H, W, stride):
    """Strided spatial subsample of a canonical tensor, re-padded to canonical."""
    N, R, C = x_c.shape
    Wp = _padded_width(W)
    x = x_c.reshape(N, H + 2, Wp, C)[:, 1:H + 1, 1:W + 1, :]
    x = x[:, ::stride, ::stride, :]
    Ho, Wo = x.shape[1], x.shape[2]
    return to_canonical(x), (Ho, Wo)


def interior_mask(H, W):
    """(R,1) f32: 1 on interior pixels of the canonical layout, 0 on ring / guard."""
    Wp = _padded_width(W)
    m = jnp.zeros((H + 2, Wp), jnp.float32).at[1:H + 1, 1:W + 1].set(1.0)
    return m.reshape((H + 2) * Wp, 1)


def mask_taps(H, W):
    """(R,16) bf16: mt[a,t] = interior_mask[a + tap_shift_t] (9 taps padded to 16 lanes).
    Makes BN-before-conv shift folding exact at the borders."""
    Wp = _padded_width(W)
    m = interior_mask(H, W)[:, 0]
    cols = []
    for dy in range(3):
        for dx in range(3):
            s = dy * Wp + dx
            cols.append(jnp.pad(m[s:], (0, s)))
    mt = jnp.stack(cols, axis=1)                      # (R, 9)
    mt = jnp.pad(mt, ((0, 0), (0, 16 - 9)))
    return mt.astype(jnp.bfloat16)


def im2col3x3(x_nhwc):
    """(N,H,W,C) -> (N,H,W,9C) 3x3 patches (pad=1), channel order (dy,dx,c)."""
    N, H, W, C = x_nhwc.shape
    xp = jnp.pad(x_nhwc, ((0, 0), (1, 1), (1, 1), (0, 0)))
    cols = [xp[:, dy:dy + H, dx:dx + W, :] for dy in range(3) for dx in range(3)]
    return jnp.concatenate(cols, axis=-1)


# ----------------------------------------------------------------------------
# Weight / parameter preparation (JAX side)
# ----------------------------------------------------------------------------
def conv_taps(w, pre_scale=None):
    """(kh,kw,Cin,Cout) f32 -> (kh*kw,Cin,Cout) bf16 with optional folded per-Cin scale."""
    kh, kw, cin, cout = w.shape
    w = w.astype(jnp.float32)
    if pre_scale is not None:
        w = w * pre_scale.reshape(1, 1, cin, 1)
    return w.reshape(kh * kw, cin, cout).astype(jnp.bfloat16)


def bias_taps_q(w, pre_shift):
    """(16,Cout) bf16: q[t,c] = sum_i w[t,i,c] * pre_shift[i] (taps padded 9->16)."""
    kh, kw, cin, cout = w.shape
    wt = w.reshape(kh * kw, cin, cout).astype(jnp.float32)
    q = jnp.einsum("tic,i->tc", wt, pre_shift.astype(jnp.float32))
    q = jnp.pad(q, ((0, 16 - kh * kw), (0, 0)))
    return q.astype(jnp.bfloat16)


def pack_pairs(x_c):
    """(N,R,C) -> (N//2,R,2C): images 2k / 2k+1 share the lane dimension."""
    return jnp.concatenate([x_c[0::2], x_c[1::2]], axis=-1)


def unpack_pairs(x_c, C):
    N2, R, _ = x_c.shape
    return jnp.stack([x_c[..., :C], x_c[..., C:]], axis=1).reshape(2 * N2, R, C)


def blockdiag2(w_taps):
    """(T,Cin,Cout) -> (T,2Cin,2Cout) block-diagonal weights for pair-packed images."""
    T, ci, co = w_taps.shape
    z = jnp.zeros((T, ci, co), w_taps.dtype)
    top = jnp.concatenate([w_taps, z], axis=2)
    bot = jnp.concatenate([z, w_taps], axis=2)
    return jnp.concatenate([top, bot], axis=1)


# ----------------------------------------------------------------------------
# Fused conv kernel on the canonical layout
# ----------------------------------------------------------------------------
def _conv_canonical_kernel(*refs, taps, A, row_lo, R_out, TA,
                           use_bias, use_res, use_alpha):
    """out = mask * ( PReLU?( BN(conv_taps(x) + mask_tap_bias?) + res? ) ), canonical."""
    idx = 0
    x_ref = refs[idx]; idx += 1          # (1, R, Cin)    bf16 activation slab
    w_ref = refs[idx]; idx += 1          # (T, Cin, tcn)  bf16 tap weights
    scale_ref = refs[idx]; idx += 1      # (1, tcn)       f32 folded-BN scale
    shift_ref = refs[idx]; idx += 1      # (1, tcn)       f32 folded-BN shift
    mask_ref = refs[idx]; idx += 1       # (R, 1)         f32 interior mask
    mtap_ref = q_ref = res_ref = alpha_ref = None
    if use_bias:
        mtap_ref = refs[idx]; idx += 1   # (R, 16)        bf16 shifted-mask taps
        q_ref = refs[idx]; idx += 1      # (16, tcn)      bf16 folded pre-BN shift
    if use_res:
        res_ref = refs[idx]; idx += 1    # (1, R, tcn)    bf16 residual (canonical)
    if use_alpha:
        alpha_ref = refs[idx]; idx += 1  # (1, tcn)       f32 PReLU slope
    o_ref = refs[idx]                    # (1, R, tcn)    bf16 output (canonical)

    tcn = o_ref.shape[-1]

    # Zero only the ring rows that no anchor tile writes (3x3 convs only).
    if row_lo > 0:
        o_ref[0, :row_lo, :] = jnp.zeros((row_lo, tcn), o_ref.dtype)
    tail = R_out - (row_lo + A)
    if tail > 0:
        o_ref[0, row_lo + A:, :] = jnp.zeros((tail, tcn), o_ref.dtype)

    scale = scale_ref[...]
    shift = shift_ref[...]
    alpha = alpha_ref[...] if use_alpha else None
    q = q_ref[...] if use_bias else None

    def do_tile(a0, size):
        # Taps accumulated back-to-back into a small f32 accumulator (<=128 KiB);
        # the epilogue is applied per tile and each output row is stored exactly once.
        acc = jnp.dot(x_ref[0, pl.ds(a0 + taps[0], size), :], w_ref[0],
                      preferred_element_type=jnp.float32)
        for t in range(1, len(taps)):
            acc = acc + jnp.dot(x_ref[0, pl.ds(a0 + taps[t], size), :], w_ref[t],
                                preferred_element_type=jnp.float32)
        if use_bias:
            acc = acc + jnp.dot(mtap_ref[pl.ds(a0, size), :], q,
                                preferred_element_type=jnp.float32)
        y = acc * scale + shift
        if use_res:
            y = y + res_ref[0, pl.ds(a0 + row_lo, size), :].astype(jnp.float32)
        if use_alpha:
            y = jnp.where(y >= 0.0, y, y * alpha)
        y = y * mask_ref[pl.ds(a0 + row_lo, size), :]
        o_ref[0, pl.ds(a0 + row_lo, size), :] = y.astype(o_ref.dtype)

    n_full, rem = divmod(A, TA)
    # Static unroll: offsets stay static (sublane-aligned tiles) and the LLO scheduler
    # sees the whole tap chain; tile count is bounded (~50 at 112x112).
    for i in range(n_full):
        do_tile(i * TA, TA)
    if rem:
        do_tile(n_full * TA, rem)


def conv_canonical(x_c, w_taps, post_scale, post_shift, *, H, W, ksize,
                   bias_taps=None, res_c=None, alpha=None):
    """3x3 (pad=1, stride 1) or 1x1 conv on the canonical layout, fully fused epilogue."""
    N, R, Cin = x_c.shape
    T, Cin2, Cout = w_taps.shape
    assert Cin2 == Cin
    Wp = _padded_width(W)
    assert R == (H + 2) * Wp

    if ksize == 3:
        assert T == 9
        taps = tuple(dy * Wp + dx for dy in range(3) for dx in range(3))
        A = (H - 1) * Wp + W           # anchors covering every interior output pixel
        row_lo = Wp + 1                # anchor a -> output flat row a + Wp + 1
    else:
        assert ksize == 1 and T == 1
        taps = (0,)
        A = R
        row_lo = 0

    use_bias = bias_taps is not None
    use_res = res_c is not None
    use_alpha = alpha is not None

    # Cout tile: 256-wide on v6e/v7x MXUs, 128 otherwise; full Cout when lane-sparse.
    if Cout % 256 == 0 and _LANE_TILE >= 256:
        tcn = 256
    elif Cout % 128 == 0:
        tcn = 128
    else:
        tcn = Cout
    n_cblk = Cout // tcn

    # Anchor tile: keep the f32 accumulator <= 128 KiB (256-512 anchors per step).
    TA = max(8, min(512, (32768 // tcn) // 8 * 8))

    # Deep stages: weight block > activation slab -> keep weights resident across batch.
    batch_inner = (T * tcn > R) and (N > 1)
    if batch_inner:
        grid = (n_cblk, N)
        def _n(g0, g1): return g1
        def _j(g0, g1): return g0
    else:
        grid = (N, n_cblk)
        def _n(g0, g1): return g0
        def _j(g0, g1): return g1

    mask = interior_mask(H, W)

    in_specs = [
        pl.BlockSpec((1, R, Cin), lambda g0, g1: (_n(g0, g1), 0, 0)),   # activation slab
        pl.BlockSpec((T, Cin, tcn), lambda g0, g1: (0, 0, _j(g0, g1))),  # tap weights
        pl.BlockSpec((1, tcn), lambda g0, g1: (0, _j(g0, g1))),          # BN scale
        pl.BlockSpec((1, tcn), lambda g0, g1: (0, _j(g0, g1))),          # BN shift
        pl.BlockSpec((R, 1), lambda g0, g1: (0, 0)),                     # interior mask
    ]
    args = [x_c, w_taps,
            post_scale.reshape(1, Cout).astype(jnp.float32),
            post_shift.reshape(1, Cout).astype(jnp.float32),
            mask]
    if use_bias:
        mt, q = bias_taps
        in_specs += [pl.BlockSpec((R, 16), lambda g0, g1: (0, 0)),
                     pl.BlockSpec((16, tcn), lambda g0, g1: (0, _j(g0, g1)))]
        args += [mt, q]
    if use_res:
        in_specs.append(pl.BlockSpec((1, R, tcn),
                                     lambda g0, g1: (_n(g0, g1), 0, _j(g0, g1))))
        args.append(res_c)
    if use_alpha:
        in_specs.append(pl.BlockSpec((1, tcn), lambda g0, g1: (0, _j(g0, g1))))
        args.append(alpha.reshape(1, Cout).astype(jnp.float32))

    kernel = functools.partial(
        _conv_canonical_kernel,
        taps=taps, A=A, row_lo=row_lo, R_out=R, TA=TA,
        use_bias=use_bias, use_res=use_res, use_alpha=use_alpha)

    return pl.pallas_call(
        kernel,
        out_shape=jax.ShapeDtypeStruct((N, R, Cout), jnp.bfloat16),
        grid=grid,
        in_specs=in_specs,
        out_specs=pl.BlockSpec((1, R, tcn), lambda g0, g1: (_n(g0, g1), 0, _j(g0, g1))),
        compiler_params=pltpu.CompilerParams(
            dimension_semantics=("parallel", "parallel"),
            vmem_limit_bytes=_VMEM_LIMIT,
        ),
    )(*args)


# ----------------------------------------------------------------------------
# Small helper kernels: adaptive avg-pool and EqualLinear
# ----------------------------------------------------------------------------
def _pool_kernel(x_ref, o_ref, *, inv_count):
    o_ref[...] = jnp.sum(x_ref[...].astype(jnp.float32), axis=1) * inv_count


def avgpool_canonical(x_c, H, W):
    """AdaptiveAvgPool2d((1,1)) on a canonical tensor (zero ring -> row-sum / (H*W))."""
    N, R, C = x_c.shape
    kernel = functools.partial(_pool_kernel, inv_count=1.0 / float(H * W))
    return pl.pallas_call(
        kernel,
        out_shape=jax.ShapeDtypeStruct((N, C), jnp.float32),
        grid=(1,),
        in_specs=[pl.BlockSpec((N, R, C), lambda i: (0, 0, 0))],
        out_specs=pl.BlockSpec((N, C), lambda i: (0, 0)),
        compiler_params=pltpu.CompilerParams(vmem_limit_bytes=_VMEM_LIMIT),
    )(x_c)


def _linear_kernel(x_ref, w_ref, s_ref, b_ref, o_ref):
    y = jnp.dot(x_ref[...], w_ref[...], preferred_element_type=jnp.float32)
    o_ref[...] = y * s_ref[...] + b_ref[...]


def equal_linear(x, w, bias, scale):
    """EqualLinear (lr_mul=1): (x @ W) * (1/sqrt(in_dim)) + bias."""
    N, K = x.shape
    _, M = w.shape
    s = jnp.full((1, M), scale, jnp.float32)
    b = bias.reshape(1, M).astype(jnp.float32)
    return pl.pallas_call(
        _linear_kernel,
        out_shape=jax.ShapeDtypeStruct((N, M), jnp.float32),
        grid=(1,),
        in_specs=[pl.BlockSpec((N, K), lambda i: (0, 0)),
                  pl.BlockSpec((K, M), lambda i: (0, 0)),
                  pl.BlockSpec((1, M), lambda i: (0, 0)),
                  pl.BlockSpec((1, M), lambda i: (0, 0))],
        out_specs=pl.BlockSpec((N, M), lambda i: (0, 0)),
        compiler_params=pltpu.CompilerParams(vmem_limit_bytes=_VMEM_LIMIT),
    )(x.astype(jnp.bfloat16), w.astype(jnp.bfloat16), s, b)


# ----------------------------------------------------------------------------
# Model definition / deterministic parameter init
# ----------------------------------------------------------------------------
def get_blocks(num_layers):
    if num_layers == 50:
        cfg = [(64, 64, 3), (64, 128, 4), (128, 256, 14), (256, 512, 3)]
    elif num_layers == 100:
        cfg = [(64, 64, 3), (64, 128, 13), (128, 256, 30), (256, 512, 3)]
    elif num_layers == 152:
        cfg = [(64, 64, 3), (64, 128, 8), (128, 256, 36), (256, 512, 3)]
    else:
        raise ValueError("num_layers should be 50, 100 or 152")
    blocks = []
    for in_c, depth, num_units in cfg:
        blocks.append([(in_c, depth, 2)] + [(depth, depth, 1)] * (num_units - 1))
    return blocks


def _init_conv(key, kh, kw, cin, cout):
    std = math.sqrt(2.0 / (kh * kw * cin))
    return jax.random.normal(key, (kh, kw, cin, cout), jnp.float32) * std


def _init_bn(key, c):
    k1, k2, k3, k4 = jax.random.split(key, 4)
    gamma = 1.0 + 0.1 * jax.random.normal(k1, (c,), jnp.float32)
    beta = 0.1 * jax.random.normal(k2, (c,), jnp.float32)
    mean = 0.1 * jax.random.normal(k3, (c,), jnp.float32)
    var = jax.random.uniform(k4, (c,), jnp.float32, minval=0.5, maxval=1.5)
    return gamma, beta, mean, var


def fold_bn(gamma, beta, mean, var, eps=1e-5):
    scale = gamma / jnp.sqrt(var + eps)
    shift = beta - mean * scale
    return scale, shift


def init_params(key, num_layers=50, input_nc=3):
    keys = iter(jax.random.split(key, 1024))
    nk = lambda: next(keys)
    params = {
        "input_conv": _init_conv(nk(), 3, 3, input_nc, 64),
        "input_bn": _init_bn(nk(), 64),
        "input_prelu": jnp.full((64,), 0.25, jnp.float32),
        "body": [],
    }
    for units in get_blocks(num_layers):
        for (in_c, depth, stride) in units:
            unit = {
                "in_c": in_c, "depth": depth, "stride": stride,
                "bn1": _init_bn(nk(), in_c),
                "conv1": _init_conv(nk(), 3, 3, in_c, depth),
                "prelu": jnp.full((depth,), 0.25, jnp.float32),
                "conv2": _init_conv(nk(), 3, 3, depth, depth),
                "bn2": _init_bn(nk(), depth),
            }
            if in_c != depth:
                unit["short_conv"] = _init_conv(nk(), 1, 1, in_c, depth).reshape(in_c, depth)
                unit["short_bn"] = _init_bn(nk(), depth)
            params["body"].append(unit)
    # EqualLinear(512, 512, lr_mul=1): weight ~ randn, bias = 0, forward scale 1/sqrt(512)
    params["lin_w"] = jax.random.normal(nk(), (512, 512), jnp.float32)   # (in, out)
    params["lin_b"] = jnp.zeros((512,), jnp.float32)
    params["lin_scale"] = 1.0 / math.sqrt(512.0)
    return params


# ----------------------------------------------------------------------------
# Forward pass (mirrors BackboneEncoderUsingLastLayerIntoW.forward, eval mode)
# ----------------------------------------------------------------------------
def forward(params, x_nchw):
    x = jnp.transpose(x_nchw, (0, 2, 3, 1)).astype(jnp.bfloat16)   # NCHW -> NHWC
    N, H, W, _ = x.shape
    packed = (N % 2 == 0) and (N >= 2)   # pair-pack the 64-channel stages into 128 lanes

    mt_cache = {}
    def mtaps(h, w):
        if (h, w) not in mt_cache:
            mt_cache[(h, w)] = mask_taps(h, w)
        return mt_cache[(h, w)]

    def dup_if(v, pk):
        return jnp.concatenate([v, v], axis=-1) if pk else v

    # ---- input layer: im2col (Cin=3 -> single K=27 dot) + fused BN + PReLU ----------
    patches = im2col3x3(x)                                # (N, H, W, 9*input_nc)
    xc = to_canonical(patches)
    w_in = conv_taps(params["input_conv"].reshape(1, 1, -1, 64))   # (1, 27, 64)
    s, b = fold_bn(*params["input_bn"])
    alpha0 = params["input_prelu"]
    if packed:
        xc = pack_pairs(xc)
        w_in = blockdiag2(w_in)
        s, b, alpha0 = dup_if(s, True), dup_if(b, True), dup_if(alpha0, True)
    xc = conv_canonical(xc, w_in, s, b, H=H, W=W, ksize=1, alpha=alpha0)
    cur_packed = packed

    # ---- body: bottleneck_IR units ---------------------------------------------------
    for unit in params["body"]:
        in_c, depth, stride = unit["in_c"], unit["depth"], unit["stride"]
        if cur_packed and not (in_c == 64 and depth == 64):
            xc = unpack_pairs(xc, 64)                      # leave packed mode
            cur_packed = False
        pk = cur_packed

        s1, b1 = fold_bn(*unit["bn1"])
        s2, b2 = fold_bn(*unit["bn2"])
        # bn1 folded into conv1: scale into the weights, shift via the mask-tap matmul.
        w1 = conv_taps(unit["conv1"], pre_scale=s1)
        q1 = bias_taps_q(unit["conv1"], b1)
        w2 = conv_taps(unit["conv2"])
        alpha1 = unit["prelu"]
        if pk:
            w1, w2 = blockdiag2(w1), blockdiag2(w2)
            q1 = dup_if(q1, True)
            s2, b2, alpha1 = dup_if(s2, True), dup_if(b2, True), dup_if(alpha1, True)
        co = w1.shape[-1]
        one = jnp.ones((co,), jnp.float32)
        zero = jnp.zeros((co,), jnp.float32)

        # residual branch: BN1 -> Conv3x3(s=1) -> PReLU   (single fused kernel)
        xr = conv_canonical(xc, w1, one, zero, H=H, W=W, ksize=3,
                            bias_taps=(mtaps(H, W), q1), alpha=alpha1)

        if stride == 1:
            if in_c == depth:
                shortcut = xc                              # MaxPool2d(1,1) == identity
            else:
                ss, sb = fold_bn(*unit["short_bn"])
                shortcut = conv_canonical(
                    xc, unit["short_conv"].reshape(1, in_c, depth).astype(jnp.bfloat16),
                    ss, sb, H=H, W=W, ksize=1)
            # Conv3x3(s=1) -> BN2 -> +shortcut   (single fused kernel)
            xc = conv_canonical(xr, w2, s2, b2, H=H, W=W, ksize=3, res_c=shortcut)
        else:
            if in_c == depth:
                # Fuse the MaxPool2d(1,stride) shortcut at full resolution, subsample once.
                y_full = conv_canonical(xr, w2, s2, b2, H=H, W=W, ksize=3, res_c=xc)
                xc, (H, W) = downsample_canonical(y_full, H, W, stride)
            else:
                # TODO(synk): stride-2 conv2 still computes the odd output rows.
                y_full = conv_canonical(xr, w2, s2, b2, H=H, W=W, ksize=3)
                y_ds, (Ho, Wo) = downsample_canonical(y_full, H, W, stride)
                x_ds, _ = downsample_canonical(xc, H, W, stride)
                ss, sb = fold_bn(*unit["short_bn"])
                # Conv1x1(stride) -> BN -> +residual branch  (fused)
                xc = conv_canonical(
                    x_ds, unit["short_conv"].reshape(1, in_c, depth).astype(jnp.bfloat16),
                    ss, sb, H=Ho, W=Wo, ksize=1, res_c=y_ds)
                H, W = Ho, Wo

    if cur_packed:
        xc = unpack_pairs(xc, 64)

    # ---- AdaptiveAvgPool2d((1,1)) -> view(-1, 512) -> EqualLinear --------------------
    pooled = avgpool_canonical(xc, H, W)                   # (N, 512) f32
    return equal_linear(pooled, params["lin_w"], params["lin_b"], params["lin_scale"])


# ----------------------------------------------------------------------------
if __name__ == "__main__":
    key = jax.random.PRNGKey(0)
    kp, kx = jax.random.split(key)

    num_layers = 50
    input_nc = 3
    batch, spatial = 2, 16   # small, consistent with the module (112 in production)

    params = init_params(kp, num_layers=num_layers, input_nc=input_nc)
    x = jax.random.normal(kx, (batch, input_nc, spatial, spatial), jnp.float32)  # NCHW

    out = forward(params, x)
    out = jax.block_until_ready(out)

    assert out.shape == (batch, 512), out.shape
    assert bool(jnp.all(jnp.isfinite(out)))
    print("KERNEL_OK")
</pallas_src>

<mosaic_0001>
module attributes {stable_mosaic.version = 11 : i64} {
  func.func @_conv_canonical_kernel(%arg0: i32, %arg1: i32, %arg2: memref<1x432x54xbf16, #tpu.memory_space<vmem>>, %arg3: memref<1x54x128xbf16, #tpu.memory_space<vmem>>, %arg4: memref<1x128xf32, #tpu.memory_space<vmem>>, %arg5: memref<1x128xf32, #tpu.memory_space<vmem>>, %arg6: memref<432x1xf32, #tpu.memory_space<vmem>>, %arg7: memref<1x128xf32, #tpu.memory_space<vmem>>, %arg8: memref<1x432x128xbf16, #tpu.memory_space<vmem>>) attributes {dimension_semantics = [#tpu.dimension_semantics<parallel>, #tpu.dimension_semantics<parallel>], iteration_bounds = array<i64: 1, 1>, scalar_prefetch = 0 : i64, scratch_operands = 0 : i64, tpu.core_type = #tpu.core_type<tc>, window_params = [{transform_indices = @transform_0, window_bounds = array<i64: 1, 432, 54>}, {transform_indices = @transform_1, window_bounds = array<i64: 1, 54, 128>}, {transform_indices = @transform_2, window_bounds = array<i64: 1, 128>}, {transform_indices = @transform_3, window_bounds = array<i64: 1, 128>}, {pipeline_mode = #tpu.pipeline_mode<synchronous>, transform_indices = @transform_4, window_bounds = array<i64: 432, 1>}, {transform_indices = @transform_5, window_bounds = array<i64: 1, 128>}, {transform_indices = @transform_6, window_bounds = array<i64: 1, 432, 128>}]} {
    %c0 = arith.constant 0 : index
    %c0_0 = arith.constant 0 : index
    %0 = vector.load %arg4[%c0, %c0_0] : memref<1x128xf32, #tpu.memory_space<vmem>>, vector<1x128xf32>
    %c0_1 = arith.constant 0 : index
    %c0_2 = arith.constant 0 : index
    %1 = vector.load %arg5[%c0_1, %c0_2] : memref<1x128xf32, #tpu.memory_space<vmem>>, vector<1x128xf32>
    %c0_3 = arith.constant 0 : index
    %c0_4 = arith.constant 0 : index
    %2 = vector.load %arg7[%c0_3, %c0_4] : memref<1x128xf32, #tpu.memory_space<vmem>>, vector<1x128xf32>
    %c0_5 = arith.constant 0 : index
    %c0_6 = arith.constant 0 : index
    %c0_7 = arith.constant 0 : index
    %3 = vector.load %arg2[%c0_5, %c0_6, %c0_7] : memref<1x432x54xbf16, #tpu.memory_space<vmem>>, vector<1x256x54xbf16>
    %4 = vector.shape_cast %3 : vector<1x256x54xbf16> to vector<256x54xbf16>
    %c0_8 = arith.constant 0 : index
    %c0_9 = arith.constant 0 : index
    %c0_10 = arith.constant 0 : index
    %5 = vector.load %arg3[%c0_8, %c0_9, %c0_10] : memref<1x54x128xbf16, #tpu.memory_space<vmem>>, vector<1x54x128xbf16>
    %6 = vector.shape_cast %5 : vector<1x54x128xbf16> to vector<54x128xbf16>
    %cst = arith.constant dense<0.000000e+00> : vector<256x128xf32>
    %7 = tpu.matmul %4, %6, %cst {dimension_numbers = #tpu.dot_dimension_numbers<[1], [0], [0], [1], [0, 0, 1, 1], [], []>} : vector<256x54xbf16>, vector<54x128xbf16>, vector<256x128xf32> -> vector<256x128xf32>
    %8 = vector.broadcast %0 : vector<1x128xf32> to vector<256x128xf32>
    %9 = arith.mulf %7, %8 : vector<256x128xf32>
    %10 = vector.broadcast %1 : vector<1x128xf32> to vector<256x128xf32>
    %11 = arith.addf %9, %10 : vector<256x128xf32>
    %cst_11 = arith.constant 0.000000e+00 : f32
    %12 = vector.broadcast %cst_11 : f32 to vector<256x128xf32>
    %13 = arith.cmpf oge, %11, %12 : vector<256x128xf32>
    %14 = vector.broadcast %2 : vector<1x128xf32> to vector<256x128xf32>
    %15 = arith.mulf %11, %14 : vector<256x128xf32>
    %16 = arith.select %13, %11, %15 : vector<256x128xi1>, vector<256x128xf32>
    %c0_12 = arith.constant 0 : index
    %c0_13 = arith.constant 0 : index
    %17 = vector.load %arg6[%c0_12, %c0_13] : memref<432x1xf32, #tpu.memory_space<vmem>>, vector<256x1xf32>
    %18 = vector.broadcast %17 : vector<256x1xf32> to vector<256x128xf32>
    %19 = arith.mulf %16, %18 : vector<256x128xf32>
    %20 = arith.truncf %19 : vector<256x128xf32> to vector<256x128xbf16>
    %c0_14 = arith.constant 0 : index
    %c0_15 = arith.constant 0 : index
    %c0_16 = arith.constant 0 : index
    %21 = vector.load %arg8[%c0_14, %c0_15, %c0_16] : memref<1x432x128xbf16, #tpu.memory_space<vmem>>, vector<1x256x128xbf16>
    %22 = vector.shape_cast %21 : vector<1x256x128xbf16> to vector<256x128xbf16>
    %23 = vector.shape_cast %20 : vector<256x128xbf16> to vector<1x256x128xbf16>
    tpu.vector_store %arg8[%c0_14, %c0_15, %c0_16], %23 {strides = array<i32>} : memref<1x432x128xbf16, #tpu.memory_space<vmem>>, vector<1x256x128xbf16>,
    %c0_17 = arith.constant 0 : index
    %c256 = arith.constant 256 : index
    %c0_18 = arith.constant 0 : index
    %24 = vector.load %arg2[%c0_17, %c256, %c0_18] : memref<1x432x54xbf16, #tpu.memory_space<vmem>>, vector<1x176x54xbf16>
    %25 = vector.shape_cast %24 : vector<1x176x54xbf16> to vector<176x54xbf16>
    %c0_19 = arith.constant 0 : index
    %c0_20 = arith.constant 0 : index
    %c0_21 = arith.constant 0 : index
    %26 = vector.load %arg3[%c0_19, %c0_20, %c0_21] : memref<1x54x128xbf16, #tpu.memory_space<vmem>>, vector<1x54x128xbf16>
    %27 = vector.shape_cast %26 : vector<1x54x128xbf16> to vector<54x128xbf16>
    %cst_22 = arith.constant dense<0.000000e+00> : vector<176x128xf32>
    %28 = tpu.matmul %25, %27, %cst_22 {dimension_numbers = #tpu.dot_dimension_numbers<[1], [0], [0], [1], [0, 0, 1, 1], [], []>} : vector<176x54xbf16>, vector<54x128xbf16>, vector<176x128xf32> -> vector<176x128xf32>
    %29 = vector.broadcast %0 : vector<1x128xf32> to vector<176x128xf32>
    %30 = arith.mulf %28, %29 : vector<176x128xf32>
    %31 = vector.broadcast %1 : vector<1x128xf32> to vector<176x128xf32>
    %32 = arith.addf %30, %31 : vector<176x128xf32>
    %cst_23 = arith.constant 0.000000e+00 : f32
    %33 = vector.broadcast %cst_23 : f32 to vector<176x128xf32>
    %34 = arith.cmpf oge, %32, %33 : vector<176x128xf32>
    %35 = vector.broadcast %2 : vector<1x128xf32> to vector<176x128xf32>
    %36 = arith.mulf %32, %35 : vector<176x128xf32>
    %37 = arith.select %34, %32, %36 : vector<176x128xi1>, vector<176x128xf32>
    %c256_24 = arith.constant 256 : index
    %c0_25 = arith.constant 0 : index
    %38 = vector.load %arg6[%c256_24, %c0_25] : memref<432x1xf32, #tpu.memory_space<vmem>>, vector<176x1xf32>
    %39 = vector.broadcast %38 : vector<176x1xf32> to vector<176x128xf32>
    %40 = arith.mulf %37, %39 : vector<176x128xf32>
    %41 = arith.truncf %40 : vector<176x128xf32> to vector<176x128xbf16>
    %c0_26 = arith.constant 0 : index
    %c256_27 = arith.constant 256 : index
    %c0_28 = arith.constant 0 : index
    %42 = vector.load %arg8[%c0_26, %c256_27, %c0_28] : memref<1x432x128xbf16, #tpu.memory_space<vmem>>, vector<1x176x128xbf16>
    %43 = vector.shape_cast %42 : vector<1x176x128xbf16> to vector<176x128xbf16>
    %44 = vector.shape_cast %41 : vector<176x128xbf16> to vector<1x176x128xbf16>
    tpu.vector_store %arg8[%c0_26, %c256_27, %c0_28], %44 {strides = array<i32>} : memref<1x432x128xbf16, #tpu.memory_space<vmem>>, vector<1x176x128xbf16>,
    return
  }
  func.func @transform_0(%arg0: i32, %arg1: i32) -> (i32, i32, i32) {
    %c0_i32 = arith.constant 0 : i32
    %c0_i32_0 = arith.constant 0 : i32
    %c0_i32_1 = arith.constant 0 : i32
    return %arg0, %c0_i32, %c0_i32_0 : i32, i32, i32
  }
  func.func @transform_1(%arg0: i32, %arg1: i32) -> (i32, i32, i32) {
    %c0_i32 = arith.constant 0 : i32
    %c0_i32_0 = arith.constant 0 : i32
    %c0_i32_1 = arith.constant 0 : i32
    return %c0_i32, %c0_i32_0, %arg1 : i32, i32, i32
  }
  func.func @transform_2(%arg0: i32, %arg1: i32) -> (i32, i32) {
    %c0_i32 = arith.constant 0 : i32
    %c0_i32_0 = arith.constant 0 : i32
    return %c0_i32, %arg1 : i32, i32
  }
  func.func @transform_3(%arg0: i32, %arg1: i32) -> (i32, i32) {
    %c0_i32 = arith.constant 0 : i32
    %c0_i32_0 = arith.constant 0 : i32
    return %c0_i32, %arg1 : i32, i32
  }
  func.func @transform_4(%arg0: i32, %arg1: i32) -> (i32, i32) {
    %c0_i32 = arith.constant 0 : i32
    %c0_i32_0 = arith.constant 0 : i32
    %c0_i32_1 = arith.constant 0 : i32
    return %c0_i32, %c0_i32_0 : i32, i32
  }
  func.func @transform_5(%arg0: i32, %arg1: i32) -> (i32, i32) {
    %c0_i32 = arith.constant 0 : i32
    %c0_i32_0 = arith.constant 0 : i32
    return %c0_i32, %arg1 : i32, i32
  }
  func.func @transform_6(%arg0: i32, %arg1: i32) -> (i32, i32, i32) {
    %c0_i32 = arith.constant 0 : i32
    %c0_i32_0 = arith.constant 0 : i32
    return %arg0, %c0_i32, %arg1 : i32, i32, i32
  }
}

</mosaic_0001>

<bundles_post_ra>
// kernel: tpu_custom_call.1
= control target key start
LH: loop header
LB: loop body
LE: loop exit
PB: predicated region body
PF: predicated region fallthrough
CT: control target
= control target key end

     0   :  { %v1699_v3 = vmov 0   ;;  %vm217_vm0 = vcmask 1042432   ;;  %s2386_s0 = inlined_call_operand.vmem [shape: bf16[1,432,54], index: 0, kind: input, shape index: {}]   ;;  %s2387_s1 = inlined_call_operand.vmem [shape: bf16[1,54,128], index: 1, kind: input, shape index: {}]   ;;  %s2388_s2 = inlined_call_operand.vmem [shape: f32[1,128], index: 2, kind: input, shape index: {}]   ;;  %s2389_s3 = inlined_call_operand.vmem [shape: f32[1,128], index: 3, kind: input, shape index: {}]   ;;  %s2390_s4 = inlined_call_operand.vmem [shape: f32[432,1], index: 4, kind: input, shape index: {}]   ;;  %s2391_s5 = inlined_call_operand.vmem [shape: f32[1,128], index: 5, kind: input, shape index: {}]   ;;  %s2392_s6 = inlined_call_operand.hbm [shape: bf16[1,432,128], index: 6, kind: output, shape index: {}]  }
   0x1   :  { %v483_v0 = vld [vmem:[%s2390_s4 + $0x20] sm:$0xff]  ;;  %v481_v1 = vld [vmem:[%s2390_s4 + $0x10] sm:$0xff]  ;;  %1669 = vset.pattern.permute.xlu2 %v1699_v3  ;;  %1668 = vset.pattern.permute.xlu1 %v1699_v3  ;;  %v66_v4 = vld [vmem:[%s2387_s1 + $0x18] sm:$0x7] }
   0x2   :  { %v479_v2 = vld [vmem:[%s2390_s4] sm:$0xff]  ;;  %v795_v5 = vld [vmem:[%s2387_s1 + $0x18] sm:$0x7]  ;;  %1667 = vset.pattern.permute.xlu0 %v1699_v3  ;;  %533 = vperm.xlu2 %1669, %v483_v0   ;;  %v160_v6 = vunpack.c.l.b16 %v66_v4  ;;  %v484_v12 = vld [vmem:[%s2390_s4 + $0x28] sm:$0xff] }
   0x3   :  { %v864_v7 = vunpack.c.l.b16 %v795_v5  ;;  %523 = vperm.xlu1 %1668, %v481_v1   ;;  %513 = vperm.xlu0 %1667, %v479_v2   ;;  %v482_v13 = vld [vmem:[%s2390_s4 + $0x18] sm:$0xff]  ;;  %v480_v14 = vld [vmem:[%s2390_s4 + $0x8] sm:$0xff]  ;;  %v1475_v15 = vld [vmem:[%s2387_s1 + $0x10] sm:$0xff] }
   0x4   :  { %v164_v8 = vpack.c.b16 %v160_v6, %v160_v6  ;;  %v1489_v16 = vld [vmem:[%s2387_s1 + $0x10] sm:$0xff]  ;;  %v1474_v17 = vld [vmem:[%s2387_s1 + $0x8] sm:$0xff] }
   0x5   :  { %v868_v9 = vpack.c.b16 %v864_v7, %v864_v7 }
   0x6   :  { %v219_v10 = vsel %vm217_vm0, %v164_v8, 0 }
   0x7   :  { %v906_v11 = vsel %vm217_vm0, %v868_v9, 0  ;;  %225 = vmatpush.bf16.msra.mxu0 %v219_v10  ;;  %1651 = vmatpush.bf16.msra.mxu2 %v219_v10 }
   0x8   :  { %1652 = vmatpush.bf16.msra.mxu3 %v219_v10  ;;  %912 = vmatpush.bf16.msra.mxu1 %v906_v11 }
   0xa   :  { %538 = vperm.xlu2 %1669, %v484_v12  }
   0xb   :  { %528 = vperm.xlu1 %1668, %v482_v13   ;;  %518 = vperm.xlu0 %1667, %v480_v14  }
   0xc   :  { %226 = vmatpush.bf16.msra.mxu0 %v1475_v15  ;;  %1653 = vmatpush.bf16.msra.mxu2 %v1475_v15 }
   0xd   :  { %11 = vsyncpa [#allocation3], 0  ;;  %1654 = vmatpush.bf16.msra.mxu3 %v1475_v15  ;;  %913 = vmatpush.bf16.msra.mxu1 %v1489_v16  ;;  %v1488_v18 = vld [vmem:[%s2387_s1 + $0x8] sm:$0xff]  ;;  %v487_v19 = vld [vmem:[%s2390_s4 + $0x40] sm:$0xff]  ;;  %vm168_vm1 = vcmask 441344   ;;  %s1286_s30 = sshll.u32 %s2392_s6, 4  ;;  %s1287_s30 = int_to_ptr.hbm [resolvable:$true] %s1286_s30 }
   0xe   :  { %v486_v20 = vld [vmem:[%s2390_s4 + $0x38] sm:$0xff]  ;;  %v485_v21 = vld [vmem:[%s2390_s4 + $0x30] sm:$0xff]  ;;  %v1473_v22 = vld [vmem:[%s2387_s1] sm:$0xff]  ;;  %s1701_s7 = smov 64   ;;  %s1702_s8 = smov 4  }
   0xf   :  { %v1487_v23 = vld [vmem:[%s2387_s1] sm:$0xff]  ;;  %v1464_v25 = vld [vmem:[%s2386_s0 + $0x38] sm:$0xff]  ;;  %v1471_v26 = vld [vmem:[%s2386_s0 + $0x70] sm:$0xff] }
  0x10   :  { %227 = vmatpush.bf16.msra.mxu0 %v1474_v17  ;;  %1655 = vmatpush.bf16.msra.mxu2 %v1474_v17  ;;  %v1457_v24 = vld [vmem:[%s2386_s0] sm:$0xff]  ;;  %v490_v28 = vld [vmem:[%s2390_s4 + $0x58] sm:$0xff]  ;;  %v489_v29 = vld [vmem:[%s2390_s4 + $0x50] sm:$0xff] }
  0x11   :  { %1656 = vmatpush.bf16.msra.mxu3 %v1474_v17  ;;  %914 = vmatpush.bf16.msra.mxu1 %v1488_v18  ;;  %v1476_v27 = vld [vmem:[%s2386_s0 + $0x80] sm:$0xff]  ;;  %v488_v30 = vld [vmem:[%s2390_s4 + $0x48] sm:$0xff]  ;;  %v493_v31 = vld [vmem:[%s2390_s4 + $0x70] sm:$0xff] }
  0x12   :  { %553 = vperm.xlu2 %1669, %v487_v19   ;;  %v492_v32 = vld [vmem:[%s2390_s4 + $0x68] sm:$0xff]  ;;  %v491_v33 = vld [vmem:[%s2390_s4 + $0x60] sm:$0xff]  ;;  %v1472_v36 = vld [vmem:[%s2386_s0 + $0x78] sm:$0xff] }
  0x13   :  { %548 = vperm.xlu1 %1668, %v486_v20   ;;  %543 = vperm.xlu0 %1667, %v485_v21   ;;  %v1458_v34 = vld [vmem:[%s2386_s0 + $0x8] sm:$0xff]  ;;  %v1465_v35 = vld [vmem:[%s2386_s0 + $0x40] sm:$0xff]  ;;  %v494_v40 = vld [vmem:[%s2390_s4 + $0x78] sm:$0xff] }
  0x14   :  { %228 = vmatpush.bf16.msra.mxu0 %v1473_v22  ;;  %1657 = vmatpush.bf16.msra.mxu2 %v1473_v22  ;;  %v1477_v37 = vld [vmem:[%s2386_s0 + $0x88] sm:$0xff]  ;;  %v495_v39 = vld [vmem:[%s2390_s4 + $0x80] sm:$0xff]  ;;  %v498_v42 = vld [vmem:[%s2390_s4 + $0x98] sm:$0xff] }
  0x15   :  { %1658 = vmatpush.bf16.msra.mxu3 %v1473_v22  ;;  %915 = vmatpush.bf16.msra.mxu1 %v1487_v23  ;;  %v496_v38 = vld [vmem:[%s2390_s4 + $0x88] sm:$0xff]  ;;  %v499_v41 = vld [vmem:[%s2390_s4 + $0xa0] sm:$0xff]  ;;  %v497_v43 = vld [vmem:[%s2390_s4 + $0x90] sm:$0xff] }
  0x16   :  { %v1459_v44 = vld [vmem:[%s2386_s0 + $0x10] sm:$0xff]  ;;  %v1466_v45 = vld [vmem:[%s2386_s0 + $0x48] sm:$0xff]  ;;  %v1483_v47 = vld [vmem:[%s2386_s0 + $0xb8] sm:$0xff] }
  0x17   :  { %1374 = vmatmul.msk.bf16.vlgmr.msra.gmra.mxu0 %vm168_vm1, %v1457_v24  ;;  %1381 = vmatmul.msk.bf16.vlgmr.msra.gmra.mxu2 %vm168_vm1, %v1464_v25  ;;  %v1478_v46 = vld [vmem:[%s2386_s0 + $0x90] sm:$0xff]  ;;  %v502_v48 = vld [vmem:[%s2390_s4 + $0xb8] sm:$0xff]  ;;  %v500_v50 = vld [vmem:[%s2390_s4 + $0xa8] sm:$0xff] }
  0x18   :  { %1388 = vmatmul.msk.bf16.vlgmr.msra.gmra.mxu3 %vm168_vm1, %v1471_v26  ;;  %1446 = vmatmul.msk.bf16.vlgmr.msra.gmra.mxu1 %vm168_vm1, %v1476_v27  ;;  %v501_v49 = vld [vmem:[%s2390_s4 + $0xb0] sm:$0xff]  ;;  %v504_v52 = vld [vmem:[%s2390_s4 + $0xc8] sm:$0xff]  ;;  %v503_v53 = vld [vmem:[%s2390_s4 + $0xc0] sm:$0xff] }
  0x19   :  { %1659 = vmatpush.bf16.msrb.mxu3 %v906_v11  ;;  %v505_v51 = vld [vmem:[%s2390_s4 + $0xd0] sm:$0xff]  ;;  %v1460_v54 = vld [vmem:[%s2386_s0 + $0x18] sm:$0xff]  ;;  %v1484_v57 = vld [vmem:[%s2386_s0 + $0xc0] sm:$0xff] }
  0x1a   :  { %568 = vperm.xlu2 %1669, %v490_v28   ;;  %v1467_v55 = vld [vmem:[%s2386_s0 + $0x50] sm:$0xff]  ;;  %v1479_v56 = vld [vmem:[%s2386_s0 + $0x98] sm:$0xff]  ;;  %v508_v58 = vld [vmem:[%s2390_s4 + $0xe8] sm:$0xff] }
  0x1b   :  { %563 = vperm.xlu1 %1668, %v489_v29   ;;  %558 = vperm.xlu0 %1667, %v488_v30   ;;  %v507_v59 = vld [vmem:[%s2390_s4 + $0xe0] sm:$0xff]  ;;  %v506_v60 = vld [vmem:[%s2390_s4 + $0xd8] sm:$0xff]  ;;  %v509_v63 = vld [vmem:[%s2390_s4 + $0xf0] sm:$0xff] }
  0x1c   :  { %v1082_v61 = vld [vmem:[%s2390_s4 + $0x100] sm:$0xff]  ;;  %v510_v62 = vld [vmem:[%s2390_s4 + $0xf8] sm:$0xff]  ;;  %v1485_v3 = vld [vmem:[%s2386_s0 + $0xc8] sm:$0xff] }
  0x1d   :  { %1660 = vmatpush.bf16.msrb.mxu3 %v1489_v16  ;;  %v1461_v0 = vld [vmem:[%s2386_s0 + $0x20] sm:$0xff]  ;;  %v1468_v1 = vld [vmem:[%s2386_s0 + $0x58] sm:$0xff]  ;;  %v1084_v5 = vld [vmem:[%s2390_s4 + $0x110] sm:$0xff] }
  0x1e   :  { %v1480_v2 = vld [vmem:[%s2386_s0 + $0xa0] sm:$0xff]  ;;  %v1085_v4 = vld [vmem:[%s2390_s4 + $0x118] sm:$0xff]  ;;  %v1083_v6 = vld [vmem:[%s2390_s4 + $0x108] sm:$0xff] }
  0x1f   :  { %v1088_v8 = vld [vmem:[%s2390_s4 + $0x130] sm:$0xff]  ;;  %v1087_v9 = vld [vmem:[%s2390_s4 + $0x128] sm:$0xff]  ;;  %v1086_v10 = vld [vmem:[%s2390_s4 + $0x120] sm:$0xff] }
  0x20   :  { %v1462_v11 = vld [vmem:[%s2386_s0 + $0x28] sm:$0xff]  ;;  %v1469_v12 = vld [vmem:[%s2386_s0 + $0x60] sm:$0xff]  ;;  %v1486_v15 = vld [vmem:[%s2386_s0 + $0xd0] sm:$0xff] }
  0x21   :  { %1661 = vmatpush.bf16.msrb.mxu3 %v1488_v18  ;;  %v1481_v14 = vld [vmem:[%s2386_s0 + $0xa8] sm:$0xff]  ;;  %v1090_v17 = vld [vmem:[%s2390_s4 + $0x140] sm:$0xff]  ;;  %v1089_v18 = vld [vmem:[%s2390_s4 + $0x138] sm:$0xff] }
  0x22   :  { %583 = vperm.xlu2 %1669, %v493_v31   ;;  %v1091_v16 = vld [vmem:[%s2390_s4 + $0x148] sm:$0xff]  ;;  %v1094_v20 = vld [vmem:[%s2390_s4 + $0x160] sm:$0xff]  ;;  %v1093_v21 = vld [vmem:[%s2390_s4 + $0x158] sm:$0xff] }
  0x23   :  { %578 = vperm.xlu1 %1668, %v492_v32   ;;  %573 = vperm.xlu0 %1667, %v491_v33   ;;  %v1092_v22 = vld [vmem:[%s2390_s4 + $0x150] sm:$0xff]  ;;  %v1470_v24 = vld [vmem:[%s2386_s0 + $0x68] sm:$0xff]  ;;  %v1097_v29 = vld [vmem:[%s2390_s4 + $0x178] sm:$0xff] }
  0x24   :  { %v1482_v26 = vld [vmem:[%s2386_s0 + $0xb0] sm:$0xff]  ;;  %v1095_v31 = vld [vmem:[%s2390_s4 + $0x168] sm:$0xff] }
  0x25   :  { %1662 = vmatpush.bf16.msrb.mxu3 %v1487_v23  ;;  %v1463_v23 = vld [vmem:[%s2386_s0 + $0x30] sm:$0xff] }
  0x26   :  { %v1096_v30 = vld [vmem:[%s2390_s4 + $0x170] sm:$0xff] }
  0x27   :  { %1375 = vmatmul.msk.bf16.gmra.mxu0 %vm168_vm1, %v1458_v34  ;;  %1382 = vmatmul.msk.bf16.gmra.mxu2 %vm168_vm1, %v1465_v35  ;;  %v1100_v35 = vld [vmem:[%s2390_s4 + $0x190] sm:$0xff] }
  0x28   :  { %1389 = vmatmul.msk.bf16.gmra.mxu3 %vm168_vm1, %v1472_v36  ;;  %1447 = vmatmul.msk.bf16.gmra.mxu1 %vm168_vm1, %v1477_v37  ;;  %v1099_v36 = vld [vmem:[%s2390_s4 + $0x188] sm:$0xff]  ;;  %v1098_v37 = vld [vmem:[%s2390_s4 + $0x180] sm:$0xff] }
  0x2a   :  { %598 = vperm.xlu2 %1669, %v496_v38  }
  0x2b   :  { %593 = vperm.xlu1 %1668, %v495_v39   ;;  %588 = vperm.xlu0 %1667, %v494_v40  }
  0x32   :  { %613 = vperm.xlu2 %1669, %v499_v41   ;;  %v1103_v41 = vld [vmem:[%s2390_s4 + $0x1a8] sm:$0xff] }
  0x33   :  { %608 = vperm.xlu1 %1668, %v498_v42   ;;  %603 = vperm.xlu0 %1667, %v497_v43   ;;  %v1102_v42 = vld [vmem:[%s2390_s4 + $0x1a0] sm:$0xff]  ;;  %v1101_v43 = vld [vmem:[%s2390_s4 + $0x198] sm:$0xff] }
  0x37   :  { %1376 = vmatmul.msk.bf16.gmra.mxu0 %vm168_vm1, %v1459_v44  ;;  %1383 = vmatmul.msk.bf16.gmra.mxu2 %vm168_vm1, %v1466_v45 }
  0x38   :  { %1448 = vmatmul.msk.bf16.gmra.mxu1 %vm168_vm1, %v1478_v46  ;;  %1453 = vmatmul.msk.bf16.vlgmr.msrb.gmra.mxu3 %vm168_vm1, %v1483_v47  ;;  %v2061_v47 = vld [vmem:[%s2388_s2] ss:$0 sm:$0xff] }
  0x3a   :  { %628 = vperm.xlu2 %1669, %v502_v48  }
  0x3b   :  { %623 = vperm.xlu1 %1668, %v501_v49   ;;  %618 = vperm.xlu0 %1667, %v500_v50   ;;  %v2067_v50 = vld [vmem:[%s2389_s3] ss:$0 sm:$0xff]  ;;  %s1700_s3 = smov [#allocation2]  }
  0x42   :  { %643 = vperm.xlu2 %1669, %v505_v51  }
  0x43   :  { %638 = vperm.xlu1 %1668, %v504_v52   ;;  %633 = vperm.xlu0 %1667, %v503_v53  }
  0x47   :  { %1377 = vmatmul.msk.bf16.gmra.mxu0 %vm168_vm1, %v1460_v54  ;;  %1384 = vmatmul.msk.bf16.gmra.mxu2 %vm168_vm1, %v1467_v55 }
  0x48   :  { %1449 = vmatmul.msk.bf16.gmra.mxu1 %vm168_vm1, %v1479_v56  ;;  %1454 = vmatmul.msk.bf16.gmra.mxu3 %vm168_vm1, %v1484_v57  ;;  %v2081_v56 = vld [vmem:[%s2391_s5] ss:$0 sm:$0xff]  ;;  %s1284_s5 = sshll.u32 %s1700_s3, 4  ;;  %s1285_s5 = int_to_ptr.vmem [resolvable:$true] %s1284_s5 }
  0x4a   :  { %658 = vperm.xlu2 %1669, %v508_v58  }
  0x4b   :  { %653 = vperm.xlu1 %1668, %v507_v59   ;;  %648 = vperm.xlu0 %1667, %v506_v60  }
  0x52   :  { %1106 = vperm.xlu2 %1669, %v1082_v61  }
  0x53   :  { %668 = vperm.xlu1 %1668, %v510_v62   ;;  %663 = vperm.xlu0 %1667, %v509_v63  }
  0x57   :  { %1378 = vmatmul.msk.bf16.gmra.mxu0 %vm168_vm1, %v1461_v0  ;;  %1385 = vmatmul.msk.bf16.gmra.mxu2 %vm168_vm1, %v1468_v1 }
  0x58   :  { %1450 = vmatmul.msk.bf16.gmra.mxu1 %vm168_vm1, %v1480_v2  ;;  %1455 = vmatmul.msk.bf16.gmra.mxu3 %vm168_vm1, %v1485_v3 }
  0x5a   :  { %1121 = vperm.xlu2 %1669, %v1085_v4  }
  0x5b   :  { %1116 = vperm.xlu1 %1668, %v1084_v5   ;;  %1111 = vperm.xlu0 %1667, %v1083_v6  }
  0x5c   :  { %v1950_v7 = vpop.permute.xlu2 %533 }
  0x62   :  { %1136 = vperm.xlu2 %1669, %v1088_v8  }
  0x63   :  { %1131 = vperm.xlu1 %1668, %v1087_v9   ;;  %1126 = vperm.xlu0 %1667, %v1086_v10  }
  0x64   :  { %v1967_v13 = vpop.permute.xlu2 %538 }
  0x67   :  { %1379 = vmatmul.msk.bf16.gmra.mxu0 %vm168_vm1, %v1462_v11  ;;  %1386 = vmatmul.msk.bf16.gmra.mxu2 %vm168_vm1, %v1469_v12 }
  0x68   :  { %1451 = vmatmul.msk.bf16.gmra.mxu1 %vm168_vm1, %v1481_v14  ;;  %1456 = vmatmul.msk.bf16.gmra.mxu3 %vm168_vm1, %v1486_v15 }
  0x6a   :  { %1151 = vperm.xlu2 %1669, %v1091_v16  }
  0x6b   :  { %1146 = vperm.xlu1 %1668, %v1090_v17   ;;  %1141 = vperm.xlu0 %1667, %v1089_v18  }
  0x6c   :  { %v1988_v19 = vpop.permute.xlu2 %553 }
  0x72   :  { %1166 = vperm.xlu2 %1669, %v1094_v20  }
  0x73   :  { %1161 = vperm.xlu1 %1668, %v1093_v21   ;;  %1156 = vperm.xlu0 %1667, %v1092_v22  }
  0x74   :  { %v2005_v25 = vpop.permute.xlu2 %568 }
  0x75   :  { %v2010_v27 = vpop.permute.xlu1 %523  ;;  %v514_v28 = vpop.permute.xlu0 %513 }
  0x77   :  { %1380 = vmatmul.msk.bf16.gmra.mxu0 %vm168_vm1, %v1463_v23  ;;  %1387 = vmatmul.msk.bf16.gmra.mxu2 %vm168_vm1, %v1470_v24 }
  0x78   :  { %1452 = vmatmul.msk.bf16.gmra.mxu1 %vm168_vm1, %v1482_v26 }
  0x7a   :  { %1181 = vperm.xlu2 %1669, %v1097_v29  }
  0x7b   :  { %1176 = vperm.xlu1 %1668, %v1096_v30   ;;  %1171 = vperm.xlu0 %1667, %v1095_v31  }
  0x7c   :  { %v2024_v32 = vpop.permute.xlu2 %583 }
  0x7d   :  { %v2026_v33 = vpop.permute.xlu1 %528  ;;  %v519_v34 = vpop.permute.xlu0 %518 }
  0x82   :  { %1196 = vperm.xlu2 %1669, %v1100_v35  }
  0x83   :  { %1191 = vperm.xlu1 %1668, %v1099_v36   ;;  %1186 = vperm.xlu0 %1667, %v1098_v37  }
  0x84   :  { %v2037_v38 = vpop.permute.xlu2 %598 }
  0x85   :  { %v2039_v39 = vpop.permute.xlu1 %548  ;;  %v2041_v40 = vpop.permute.xlu0 %543 }
  0x8a   :  { %1211 = vperm.xlu2 %1669, %v1103_v41  }
  0x8b   :  { %1206 = vperm.xlu1 %1668, %v1102_v42   ;;  %1201 = vperm.xlu0 %1667, %v1101_v43  }
  0x8c   :  { %v2056_v46 = vpop.permute.xlu2 %613 }
  0x8d   :  { %v2052_v44 = vpop.permute.xlu1 %563  ;;  %v2054_v45 = vpop.permute.xlu0 %558 }
  0x94   :  { %v230_v48 = vpop.f32.mrf.mxu0  ;;  %v2075_v54 = vpop.permute.xlu2 %628 }
  0x95   :  { %v313_v49 = vmul.f32 %v2061_v47, %v230_v48  ;;  %v2069_v51 = vpop.f32.mrf.mxu1  ;;  %v2071_v52 = vpop.permute.xlu1 %578 }
  0x96   :  { %v2073_v53 = vpop.permute.xlu0 %573 }
  0x97   :  { %v348_v55 = vadd.f32 %v2067_v50, %v313_v49 }
  0x99   :  { %v415_v61 = vmul.f32 %v2081_v56, %v348_v55  ;;  %vm380_vm2 = vcmp.ge.f32.partialorder %v348_v55, 0.0 }
  0x9a   :  { %v265_v57 = vpop.f32.mrf.mxu2 }
  0x9b   :  { %v327_v58 = vmul.f32 %v2061_v47, %v265_v57  ;;  %v300_v59 = vpop.f32.mrf.mxu3  ;;  %v447_v4 = vsel %vm380_vm2, %v348_v55, %v415_v61 }
  0x9c   :  { %v232_v60 = vpop.f32.mrf.mxu0  ;;  %v2093_v6 = vpop.permute.xlu2 %643  ;;  %v671_v14 = vmul.f32 %v514_v28, %v447_v4  ;;  %v341_v61 = vmul.f32 %v2061_v47, %v300_v59 }
  0x9d   :  { %v314_v62 = vmul.f32 %v2061_v47, %v232_v60  ;;  %v2086_v63 = vpop.f32.mrf.mxu1  ;;  %v2088_v0 = vpop.permute.xlu1 %593  ;;  %v362_v2 = vadd.f32 %v2067_v50, %v327_v58 }
  0x9e   :  { %v589_v1 = vpop.permute.xlu0 %588  ;;  %v376_v59 = vadd.f32 %v2067_v50, %v341_v61 }
  0x9f   :  { %v349_v3 = vadd.f32 %v2067_v50, %v314_v62  ;;  %v429_v9 = vmul.f32 %v2081_v56, %v362_v2  ;;  %vm394_vm4 = vcmp.ge.f32.partialorder %v362_v2, 0.0 }
  0xa0   :  { %vm408_vm11 = vcmp.ge.f32.partialorder %v376_v59, 0.0 }
  0xa1   :  { %vm381_vm3 = vcmp.ge.f32.partialorder %v349_v3, 0.0  ;;  %v416_v5 = vmul.f32 %v2081_v56, %v349_v3  ;;  %v461_v24 = vsel %vm394_vm4, %v362_v2, %v429_v9 }
  0xa2   :  { %v267_v8 = vpop.f32.mrf.mxu2  ;;  %v685_v30 = vmul.f32 %v2024_v32, %v461_v24 }
  0xa3   :  { %v448_v10 = vsel %vm381_vm3, %v349_v3, %v416_v5  ;;  %v328_v11 = vmul.f32 %v2061_v47, %v267_v8  ;;  %v302_v12 = vpop.f32.mrf.mxu3 }
  0xa4   :  { %v672_v15 = vmul.f32 %v519_v34, %v448_v10  ;;  %v235_v16 = vpop.f32.mrf.mxu0  ;;  %v2109_v41 = vpop.permute.xlu2 %658  ;;  %v342_v57 = vmul.f32 %v2061_v47, %v302_v12 }
  0xa5   :  { %v363_v17 = vadd.f32 %v2067_v50, %v328_v11  ;;  %v315_v18 = vmul.f32 %v2061_v47, %v235_v16  ;;  %v2099_v20 = vpop.f32.mrf.mxu1  ;;  %v2101_v21 = vpop.permute.xlu1 %608 }
  0xa6   :  { %v1493_v22 = vpack.c.bf16 %v672_v15, %v671_v14  ;;  %v2103_v23 = vpop.permute.xlu0 %603  ;;  %v377_v3 = vadd.f32 %v2067_v50, %v342_v57 }
  0xa7   :  { %vm395_vm5 = vcmp.ge.f32.partialorder %v363_v17, 0.0  ;;  %v430_v26 = vmul.f32 %v2081_v56, %v363_v17  ;;  %v350_v29 = vadd.f32 %v2067_v50, %v315_v18 }
  0xa8   :  { %1494 = vst [vmem:[#allocation2] sm:$0xff] %v1493_v22   ;;  %vm409_vm10 = vcmp.ge.f32.partialorder %v377_v3, 0.0 }
  0xa9   :  { %v462_v28 = vsel %vm395_vm5, %v363_v17, %v430_v26  ;;  %v417_v43 = vmul.f32 %v2081_v56, %v350_v29  ;;  %vm382_vm6 = vcmp.ge.f32.partialorder %v350_v29, 0.0 }
  0xaa   :  { %v686_v31 = vmul.f32 %v589_v1, %v462_v28  ;;  %v270_v34 = vpop.f32.mrf.mxu2  ;;  %v972_v28 = vmul.f32 %v2061_v47, %v2069_v51 }
  0xab   :  { %v329_v35 = vmul.f32 %v2061_v47, %v270_v34  ;;  %v305_v36 = vpop.f32.mrf.mxu3  ;;  %v449_v62 = vsel %vm382_vm6, %v350_v29, %v417_v43  ;;  %v443_v34 = vmul.f32 %v2081_v56, %v376_v59 }
  0xac   :  { %v1528_v37 = vpack.c.bf16 %v686_v31, %v685_v30  ;;  %v237_v42 = vpop.f32.mrf.mxu0  ;;  %v673_v10 = vmul.f32 %v2010_v27, %v449_v62  ;;  %v2136_v22 = vpop.permute.xlu2 %1106  ;;  %v444_v27 = vmul.f32 %v2081_v56, %v377_v3 }
  0xad   :  { %v316_v48 = vmul.f32 %v2061_v47, %v237_v42  ;;  %v2113_v49 = vpop.f32.mrf.mxu1  ;;  %v2115_v55 = vpop.permute.xlu1 %623  ;;  %v364_v58 = vadd.f32 %v2067_v50, %v329_v35 }
  0xae   :  { %1631 = vst [vmem:[#allocation2 + $0x38] sm:$0xff] %v1528_v37   ;;  %v2117_v32 = vpop.permute.xlu0 %618  ;;  %v343_v37 = vmul.f32 %v2061_v47, %v305_v36 }
  0xaf   :  { %v351_v60 = vadd.f32 %v2067_v50, %v316_v48  ;;  %v431_v4 = vmul.f32 %v2081_v56, %v364_v58  ;;  %vm396_vm8 = vcmp.ge.f32.partialorder %v364_v58, 0.0  ;;  %v476_v48 = vsel %vm409_vm10, %v377_v3, %v444_v27 }
  0xb0   :  { %v475_v3 = vsel %vm408_vm11, %v376_v59, %v443_v34 }
  0xb1   :  { %vm383_vm7 = vcmp.ge.f32.partialorder %v351_v60, 0.0  ;;  %v418_v1 = vmul.f32 %v2081_v56, %v351_v60  ;;  %v463_v26 = vsel %vm396_vm8, %v364_v58, %v431_v4  ;;  %v2154_v58 = vadd.f32 %v2067_v50, %v972_v28 }
  0xb2   :  { %v272_v2 = vpop.f32.mrf.mxu2  ;;  %v687_v35 = vmul.f32 %v2088_v0, %v463_v26  ;;  %v700_v4 = vmul.f32 %v2109_v41, %v476_v48 }
  0xb3   :  { %v450_v5 = vsel %vm383_vm7, %v351_v60, %v418_v1  ;;  %v330_v8 = vmul.f32 %v2061_v47, %v272_v2  ;;  %v307_v9 = vpop.f32.mrf.mxu3  ;;  %v973_v60 = vmul.f32 %v2061_v47, %v2086_v63  ;;  %vm1016_vm14 = vcmp.ge.f32.partialorder %v2154_v58, 0.0 }
  0xb4   :  { %v674_v11 = vmul.f32 %v2026_v33, %v450_v5  ;;  %v240_v12 = vpop.f32.mrf.mxu0  ;;  %v344_v30 = vmul.f32 %v2061_v47, %v307_v9  ;;  %v378_v5 = vadd.f32 %v2067_v50, %v343_v37  ;;  %v2171_v59 = vpop.permute.xlu2 %1121 }
  0xb5   :  { %v365_v14 = vadd.f32 %v2067_v50, %v330_v8  ;;  %v317_v15 = vmul.f32 %v2061_v47, %v240_v12  ;;  %v2132_v16 = vpop.f32.mrf.mxu1  ;;  %v2134_v17 = vpop.permute.xlu1 %638  ;;  %v975_v12 = vmul.f32 %v2061_v47, %v2113_v49  ;;  %v2176_v27 = vadd.f32 %v2067_v50, %v973_v60 }
  0xb6   :  { %v1498_v18 = vpack.c.bf16 %v674_v11, %v673_v10  ;;  %v2138_v24 = vpop.permute.xlu0 %633  ;;  %v379_v0 = vadd.f32 %v2067_v50, %v344_v30  ;;  %v974_v11 = vmul.f32 %v2061_v47, %v2099_v20  ;;  %v445_v20 = vmul.f32 %v2081_v56, %v378_v5 }
  0xb7   :  { %vm397_vm9 = vcmp.ge.f32.partialorder %v365_v14, 0.0  ;;  %v432_v33 = vmul.f32 %v2081_v56, %v365_v14  ;;  %v352_v31 = vadd.f32 %v2067_v50, %v317_v15  ;;  %vm410_vm0 = vcmp.ge.f32.partialorder %v378_v5, 0.0 }
  0xb8   :  { %1625 = vst [vmem:[#allocation2 + $0x8] sm:$0xff] %v1498_v18   ;;  %v446_v18 = vmul.f32 %v2081_v56, %v379_v0  ;;  %vm411_vm15 = vcmp.ge.f32.partialorder %v379_v0, 0.0  ;;  %v996_v30 = vadd.f32 %v2067_v50, %v974_v11  ;;  %v997_v37 = vadd.f32 %v2067_v50, %v975_v12 }
  0xb9   :  { %v464_v29 = vsel %vm397_vm9, %v365_v14, %v432_v33  ;;  %v419_v36 = vmul.f32 %v2081_v56, %v352_v31  ;;  %vm384_vm12 = vcmp.ge.f32.partialorder %v352_v31, 0.0  ;;  %vm1017_vm5 = vcmp.ge.f32.partialorder %v2176_v27, 0.0 }
  0xba   :  { %v688_v42 = vmul.f32 %v2037_v38, %v464_v29  ;;  %v275_v43 = vpop.f32.mrf.mxu2  ;;  %v478_v60 = vsel %vm411_vm15, %v379_v0, %v446_v18  ;;  %vm1018_vm3 = vcmp.ge.f32.partialorder %v996_v30, 0.0  ;;  %v1039_v0 = vmul.f32 %v2081_v56, %v2176_v27 }
  0xbb   :  { %v331_v51 = vmul.f32 %v2061_v47, %v275_v43  ;;  %v2151_v57 = vpop.f32.mrf.mxu3  ;;  %v451_v14 = vsel %vm384_vm12, %v352_v31, %v419_v36  ;;  %vm1019_vm4 = vcmp.ge.f32.partialorder %v997_v37, 0.0 }
  0xbc   :  { %v1533_v61 = vpack.c.bf16 %v688_v42, %v687_v35  ;;  %v242_v62 = vpop.f32.mrf.mxu0  ;;  %v675_v31 = vmul.f32 %v1950_v7, %v451_v14  ;;  %v2204_v14 = vpop.permute.xlu2 %1136 }
  0xbd   :  { %v318_v38 = vmul.f32 %v2061_v47, %v242_v62  ;;  %v929_v1 = vpop.f32.mrf.mxu1  ;;  %v654_v2 = vpop.permute.xlu1 %653  ;;  %v366_v63 = vadd.f32 %v2067_v50, %v331_v51 }
  0xbe   :  { %1632 = vst [vmem:[#allocation2 + $0x40] sm:$0xff] %v1533_v61   ;;  %v699_v8 = vmul.f32 %v654_v2, %v475_v3  ;;  %v2163_v9 = vpop.permute.xlu0 %648  ;;  %v1038_v61 = vmul.f32 %v2081_v56, %v2154_v58 }
  0xbf   :  { %v353_v10 = vadd.f32 %v2067_v50, %v318_v38  ;;  %v433_v49 = vmul.f32 %v2081_v56, %v366_v63  ;;  %vm398_vm1 = vcmp.ge.f32.partialorder %v366_v63, 0.0  ;;  %v477_v38 = vsel %vm410_vm0, %v378_v5, %v445_v20 }
  0xc0   :  { %v1563_v41 = vpack.c.bf16 %v700_v4, %v699_v8  ;;  %v977_v4 = vmul.f32 %v2061_v47, %v929_v1  ;;  %v1040_v5 = vmul.f32 %v2081_v56, %v996_v30  ;;  %v1060_v20 = vsel %vm1016_vm14, %v2154_v58, %v1038_v61 }
  0xc1   :  { %vm385_vm13 = vcmp.ge.f32.partialorder %v353_v10, 0.0  ;;  %v420_v15 = vmul.f32 %v2081_v56, %v353_v10 }
  0xc2   :  { %1638 = vst [vmem:[#allocation2 + $0x70] sm:$0xff] %v1563_v41   ;;  %v277_v26 = vpop.f32.mrf.mxu2 }
  0xc3   :  { %v452_v33 = vsel %vm385_vm13, %v353_v10, %v420_v15  ;;  %v332_v28 = vmul.f32 %v2061_v47, %v277_v26  ;;  %v2182_v29 = vpop.f32.mrf.mxu3  ;;  %v1041_v10 = vmul.f32 %v2081_v56, %v997_v37 }
  0xc4   :  { %v676_v34 = vmul.f32 %v1967_v13, %v452_v33  ;;  %v245_v35 = vpop.f32.mrf.mxu0  ;;  %v465_v13 = vsel %vm398_vm1, %v366_v63, %v433_v49  ;;  %v976_v63 = vmul.f32 %v2061_v47, %v2132_v16  ;;  %v999_v16 = vadd.f32 %v2067_v50, %v977_v4 }
  0xc5   :  { %v367_v42 = vadd.f32 %v2067_v50, %v332_v28  ;;  %v319_v43 = vmul.f32 %v2061_v47, %v245_v35  ;;  %v932_v48 = vpop.f32.mrf.mxu1  ;;  %v669_v51 = vpop.permute.xlu1 %668  ;;  %v689_v41 = vmul.f32 %v2103_v23, %v465_v13  ;;  %v1063_v28 = vsel %vm1019_vm4, %v997_v37, %v1041_v10 }
  0xc6   :  { %v1503_v62 = vpack.c.bf16 %v676_v34, %v675_v31  ;;  %v702_v36 = vmul.f32 %v669_v51, %v478_v60  ;;  %v664_v7 = vpop.permute.xlu0 %663  ;;  %v1062_v35 = vsel %vm1018_vm3, %v996_v30, %v1040_v5  ;;  %v1061_v60 = vsel %vm1017_vm5, %v2176_v27, %v1039_v0  ;;  %v2237_v5 = vpop.permute.xlu2 %1151 }
  0xc7   :  { %vm399_vm2 = vcmp.ge.f32.partialorder %v367_v42, 0.0  ;;  %v434_v2 = vmul.f32 %v2081_v56, %v367_v42  ;;  %v701_v3 = vmul.f32 %v664_v7, %v477_v38  ;;  %v354_v8 = vadd.f32 %v2067_v50, %v319_v43 }
  0xc8   :  { %1626 = vst [vmem:[#allocation2 + $0x10] sm:$0xff] %v1503_v62   ;;  %v1217_v43 = vmul.f32 %v2171_v59, %v1063_v28  ;;  %v1214_v37 = vmul.f32 %v2136_v22, %v1060_v20  ;;  %v978_v30 = vmul.f32 %v2061_v47, %v932_v48  ;;  %v1043_v59 = vmul.f32 %v2081_v56, %v999_v16 }
  0xc9   :  { %v466_v11 = vsel %vm399_vm2, %v367_v42, %v434_v2  ;;  %v1568_v12 = vpack.c.bf16 %v702_v36, %v701_v3  ;;  %v421_v23 = vmul.f32 %v2081_v56, %v354_v8  ;;  %vm386_vm6 = vcmp.ge.f32.partialorder %v354_v8, 0.0 }
  0xca   :  { %v690_v1 = vmul.f32 %v2101_v21, %v466_v11  ;;  %v280_v15 = vpop.f32.mrf.mxu2  ;;  %v998_v42 = vadd.f32 %v2067_v50, %v976_v63  ;;  %vm1021_vm8 = vcmp.ge.f32.partialorder %v999_v16, 0.0  ;;  %v986_v4 = vmul.f32 %v2061_v47, %v2151_v57 }
  0xcb   :  { %1639 = vst [vmem:[#allocation2 + $0x78] sm:$0xff] %v1568_v12   ;;  %v333_v18 = vmul.f32 %v2061_v47, %v280_v15  ;;  %v2208_v26 = vpop.f32.mrf.mxu3  ;;  %v453_v7 = vsel %vm386_vm6, %v354_v8, %v421_v23  ;;  %v1000_v12 = vadd.f32 %v2067_v50, %v978_v30 }
  0xcc   :  { %v1538_v49 = vpack.c.bf16 %v690_v1, %v689_v41  ;;  %v247_v33 = vpop.f32.mrf.mxu0  ;;  %vm1020_vm9 = vcmp.ge.f32.partialorder %v998_v42, 0.0  ;;  %v1042_v22 = vmul.f32 %v2081_v56, %v998_v42  ;;  %v677_v11 = vmul.f32 %v2041_v40, %v453_v7 }
  0xcd   :  { %v320_v21 = vmul.f32 %v2061_v47, %v247_v33  ;;  %v934_v31 = vpop.f32.mrf.mxu1  ;;  %v1117_v34 = vpop.permute.xlu1 %1116  ;;  %v368_v61 = vadd.f32 %v2067_v50, %v333_v18  ;;  %vm1022_vm12 = vcmp.ge.f32.partialorder %v1000_v12, 0.0 }
  0xce   :  { %1633 = vst [vmem:[#allocation2 + $0x48] sm:$0xff] %v1538_v49   ;;  %v1216_v58 = vmul.f32 %v1117_v34, %v1062_v35  ;;  %v1112_v51 = vpop.permute.xlu0 %1111  ;;  %v979_v2 = vmul.f32 %v2061_v47, %v934_v31  ;;  %v1065_v49 = vsel %vm1021_vm8, %v999_v16, %v1043_v59  ;;  %v2248_v35 = vadd.f32 %v2067_v50, %v986_v4 }
  0xcf   :  { %v355_v62 = vadd.f32 %v2067_v50, %v320_v21  ;;  %v1215_v36 = vmul.f32 %v1112_v51, %v1061_v60  ;;  %v435_v48 = vmul.f32 %v2081_v56, %v368_v61  ;;  %vm400_vm10 = vcmp.ge.f32.partialorder %v368_v61, 0.0 }
  0xd0   :  { %v1578_v38 = vpack.c.bf16 %v1217_v43, %v1216_v58  ;;  %v1001_v1 = vadd.f32 %v2067_v50, %v979_v2  ;;  %v1064_v21 = vsel %vm1020_vm9, %v998_v42, %v1042_v22  ;;  %v987_v43 = vmul.f32 %v2061_v47, %v2182_v29 }
  0xd1   :  { %vm387_vm7 = vcmp.ge.f32.partialorder %v355_v62, 0.0  ;;  %v422_v13 = vmul.f32 %v2081_v56, %v355_v62  ;;  %v1573_v3 = vpack.c.bf16 %v1215_v36, %v1214_v37  ;;  %v467_v31 = vsel %vm400_vm10, %v368_v61, %v435_v48  ;;  %v2271_v48 = vpop.permute.xlu2 %1166 }
  0xd2   :  { %1641 = vst [vmem:[#allocation2 + $0x88] sm:$0xff] %v1578_v38   ;;  %v282_v27 = vpop.f32.mrf.mxu2  ;;  %v1044_v16 = vmul.f32 %v2081_v56, %v1000_v12  ;;  %v1045_v42 = vmul.f32 %v2081_v56, %v1001_v1  ;;  %v691_v37 = vmul.f32 %v2056_v46, %v467_v31  ;;  %vm1023_vm13 = vcmp.ge.f32.partialorder %v1001_v1, 0.0 }
  0xd3   :  { %v454_v8 = vsel %vm387_vm7, %v355_v62, %v422_v13  ;;  %1640 = vst [vmem:[#allocation2 + $0x80] sm:$0xff] %v1573_v3   ;;  %v334_v0 = vmul.f32 %v2061_v47, %v282_v27  ;;  %v959_v10 = vpop.f32.mrf.mxu3  ;;  %v2260_v30 = vadd.f32 %v2067_v50, %v987_v43  ;;  %v2265_v46 = vmul.f32 %v2081_v56, %v2248_v35 }
  0xd4   :  { %v678_v63 = vmul.f32 %v2039_v39, %v454_v8  ;;  %v250_v41 = vpop.f32.mrf.mxu0  ;;  %v1066_v13 = vsel %vm1022_vm12, %v1000_v12, %v1044_v16  ;;  %v1067_v4 = vsel %vm1023_vm13, %v1001_v1, %v1045_v42  ;;  %vm1030_vm15 = vcmp.ge.f32.partialorder %v2248_v35, 0.0 }
  0xd5   :  { %v369_v57 = vadd.f32 %v2067_v50, %v334_v0  ;;  %v321_v15 = vmul.f32 %v2061_v47, %v250_v41  ;;  %v937_v18 = vpop.f32.mrf.mxu1  ;;  %v1132_v20 = vpop.permute.xlu1 %1131  ;;  %v989_v1 = vmul.f32 %v2061_v47, %v959_v10  ;;  %vm1031_vm1 = vcmp.ge.f32.partialorder %v2260_v30, 0.0 }
  0xd6   :  { %v1508_v23 = vpack.c.bf16 %v678_v63, %v677_v11  ;;  %v980_v40 = vmul.f32 %v2061_v47, %v937_v18  ;;  %v1219_v33 = vmul.f32 %v1132_v20, %v1065_v49  ;;  %v1127_v28 = vpop.permute.xlu0 %1126  ;;  %v1220_v63 = vmul.f32 %v2204_v14, %v1066_v13 }
  0xd7   :  { %vm401_vm11 = vcmp.ge.f32.partialorder %v369_v57, 0.0  ;;  %v436_v39 = vmul.f32 %v2081_v56, %v369_v57  ;;  %v1218_v34 = vmul.f32 %v1127_v28, %v1064_v21  ;;  %v356_v51 = vadd.f32 %v2067_v50, %v321_v15 }
  0xd8   :  { %1627 = vst [vmem:[#allocation2 + $0x18] sm:$0xff] %v1508_v23   ;;  %v1002_v62 = vadd.f32 %v2067_v50, %v980_v40 }
  0xd9   :  { %v468_v58 = vsel %vm401_vm11, %v369_v57, %v436_v39  ;;  %v1583_v60 = vpack.c.bf16 %v1219_v33, %v1218_v34  ;;  %v423_v2 = vmul.f32 %v2081_v56, %v356_v51  ;;  %vm388_vm14 = vcmp.ge.f32.partialorder %v356_v51, 0.0  ;;  %v1182_v13 = vpop.permute.xlu2 %1181 }
  0xda   :  { %v692_v61 = vmul.f32 %v2117_v32, %v468_v58  ;;  %v285_v36 = vpop.f32.mrf.mxu2  ;;  %v988_v32 = vmul.f32 %v2061_v47, %v2208_v26  ;;  %v1046_v11 = vmul.f32 %v2081_v56, %v1002_v62  ;;  %vm1024_vm0 = vcmp.ge.f32.partialorder %v1002_v62, 0.0 }
  0xdb   :  { %1642 = vst [vmem:[#allocation2 + $0x90] sm:$0xff] %v1583_v60   ;;  %v335_v29 = vmul.f32 %v2061_v47, %v285_v36  ;;  %v962_v7 = vpop.f32.mrf.mxu3  ;;  %v1053_v57 = vmul.f32 %v2081_v56, %v2260_v30  ;;  %v455_v18 = vsel %vm388_vm14, %v356_v51, %v423_v2  ;;  %v1011_v36 = vadd.f32 %v2067_v50, %v989_v1 }
  0xdc   :  { %v1543_v38 = vpack.c.bf16 %v692_v61, %v691_v37  ;;  %v252_v59 = vpop.f32.mrf.mxu0  ;;  %v1068_v40 = vsel %vm1024_vm0, %v1002_v62, %v1046_v11  ;;  %v2288_v10 = vadd.f32 %v2067_v50, %v988_v32  ;;  %v679_v39 = vmul.f32 %v1988_v19, %v455_v18 }
  0xdd   :  { %v322_v3 = vmul.f32 %v2061_v47, %v252_v59  ;;  %v939_v27 = vpop.f32.mrf.mxu1  ;;  %v1147_v22 = vpop.permute.xlu1 %1146  ;;  %v370_v8 = vadd.f32 %v2067_v50, %v335_v29  ;;  %v990_v34 = vmul.f32 %v2061_v47, %v962_v7  ;;  %v1075_v2 = vsel %vm1031_vm1, %v2260_v30, %v1053_v57 }
  0xde   :  { %1634 = vst [vmem:[#allocation2 + $0x50] sm:$0xff] %v1543_v38   ;;  %v981_v0 = vmul.f32 %v2061_v47, %v939_v27  ;;  %v1142_v12 = vpop.permute.xlu0 %1141  ;;  %v1222_v51 = vmul.f32 %v1147_v22, %v1068_v40  ;;  %v1074_v22 = vsel %vm1030_vm15, %v2248_v35, %v2265_v46  ;;  %vm1032_vm6 = vcmp.ge.f32.partialorder %v2288_v10, 0.0 }
  0xdf   :  { %v357_v26 = vadd.f32 %v2067_v50, %v322_v3  ;;  %v1221_v41 = vmul.f32 %v1142_v12, %v1067_v4  ;;  %v437_v23 = vmul.f32 %v2081_v56, %v370_v8  ;;  %vm402_vm4 = vcmp.ge.f32.partialorder %v370_v8, 0.0 }
  0xe0   :  { %v1003_v15 = vadd.f32 %v2067_v50, %v981_v0  ;;  %v1012_v3 = vadd.f32 %v2067_v50, %v990_v34  ;;  %v1054_v11 = vmul.f32 %v2081_v56, %v2288_v10  ;;  %v1229_v30 = vmul.f32 %v1182_v13, %v1075_v2 }
  0xe1   :  { %vm389_vm2 = vcmp.ge.f32.partialorder %v357_v26, 0.0  ;;  %v424_v20 = vmul.f32 %v2081_v56, %v357_v26  ;;  %v1588_v49 = vpack.c.bf16 %v1221_v41, %v1220_v63  ;;  %v469_v19 = vsel %vm402_vm4, %v370_v8, %v437_v23 }
  0xe2   :  { %vm1025_vm3 = vcmp.ge.f32.partialorder %v1003_v15, 0.0  ;;  %v1047_v14 = vmul.f32 %v2081_v56, %v1003_v15  ;;  %v287_v33 = vpop.f32.mrf.mxu2  ;;  %v693_v4 = vmul.f32 %v2115_v55, %v469_v19  ;;  %vm1033_vm7 = vcmp.ge.f32.partialorder %v1011_v36, 0.0 }
  0xe3   :  { %v456_v28 = vsel %vm389_vm2, %v357_v26, %v424_v20  ;;  %1643 = vst [vmem:[#allocation2 + $0x98] sm:$0xff] %v1588_v49   ;;  %v336_v21 = vmul.f32 %v2061_v47, %v287_v33  ;;  %v964_v31 = vpop.f32.mrf.mxu3  ;;  %v1056_v46 = vmul.f32 %v2081_v56, %v1012_v3  ;;  %vm1034_vm10 = vcmp.ge.f32.partialorder %v1012_v3, 0.0 }
  0xe4   :  { %v680_v43 = vmul.f32 %v2054_v45, %v456_v28  ;;  %v1069_v16 = vsel %vm1025_vm3, %v1003_v15, %v1047_v14  ;;  %v255_v58 = vpop.f32.mrf.mxu0  ;;  %v991_v20 = vmul.f32 %v2061_v47, %v964_v31 }
  0xe5   :  { %v1223_v60 = vmul.f32 %v2237_v5, %v1069_v16  ;;  %v371_v42 = vadd.f32 %v2067_v50, %v336_v21  ;;  %v323_v37 = vmul.f32 %v2061_v47, %v255_v58  ;;  %v942_v61 = vpop.f32.mrf.mxu1  ;;  %v2297_v62 = vpop.permute.xlu1 %1161  ;;  %v1076_v21 = vsel %vm1032_vm6, %v2288_v10, %v1054_v11 }
  0xe6   :  { %v1513_v29 = vpack.c.bf16 %v680_v43, %v679_v39  ;;  %v982_v7 = vmul.f32 %v2061_v47, %v942_v61  ;;  %v1157_v45 = vpop.permute.xlu0 %1156  ;;  %v1078_v16 = vsel %vm1034_vm10, %v1012_v3, %v1056_v46 }
  0xe7   :  { %v1593_v38 = vpack.c.bf16 %v1223_v60, %v1222_v51  ;;  %vm403_vm5 = vcmp.ge.f32.partialorder %v371_v42, 0.0  ;;  %v438_v59 = vmul.f32 %v2081_v56, %v371_v42  ;;  %v358_v5 = vadd.f32 %v2067_v50, %v323_v37  ;;  %v1197_v60 = vpop.permute.xlu2 %1196 }
  0xe8   :  { %1628 = vst [vmem:[#allocation2 + $0x20] sm:$0xff] %v1513_v29   ;;  %v1004_v32 = vadd.f32 %v2067_v50, %v982_v7 }
  0xe9   :  { %1644 = vst [vmem:[#allocation2 + $0xa0] sm:$0xff] %v1593_v38   ;;  %v470_v27 = vsel %vm403_vm5, %v371_v42, %v438_v59  ;;  %v425_v12 = vmul.f32 %v2081_v56, %v358_v5  ;;  %vm390_vm8 = vcmp.ge.f32.partialorder %v358_v5, 0.0  ;;  %v1013_v42 = vadd.f32 %v2067_v50, %v991_v20 }
  0xea   :  { %v694_v8 = vmul.f32 %v2075_v54, %v470_v27  ;;  %v290_v0 = vpop.f32.mrf.mxu2  ;;  %v1048_v35 = vmul.f32 %v2081_v56, %v1004_v32  ;;  %v1055_v54 = vmul.f32 %v2081_v56, %v1011_v36  ;;  %vm1026_vm9 = vcmp.ge.f32.partialorder %v1004_v32, 0.0 }
  0xeb   :  { %v337_v26 = vmul.f32 %v2061_v47, %v290_v0  ;;  %v967_v63 = vpop.f32.mrf.mxu3  ;;  %v457_v40 = vsel %vm390_vm8, %v358_v5, %v425_v12  ;;  %vm1035_vm1 = vcmp.ge.f32.partialorder %v1013_v42, 0.0 }
  0xec   :  { %v1548_v41 = vpack.c.bf16 %v694_v8, %v693_v4  ;;  %v257_v55 = vpop.f32.mrf.mxu0  ;;  %v992_v1 = vmul.f32 %v2061_v47, %v967_v63  ;;  %v1070_v39 = vsel %vm1026_vm9, %v1004_v32, %v1048_v35  ;;  %v1077_v31 = vsel %vm1033_vm7, %v1011_v36, %v1055_v54 }
  0xed   :  { %v324_v57 = vmul.f32 %v2061_v47, %v257_v55  ;;  %v944_v15 = vpop.f32.mrf.mxu1  ;;  %v1177_v18 = vpop.permute.xlu1 %1176  ;;  %v372_v33 = vadd.f32 %v2067_v50, %v337_v26  ;;  %v681_v37 = vmul.f32 %v2052_v44, %v457_v40  ;;  %v1224_v19 = vmul.f32 %v1157_v45, %v1070_v39 }
  0xee   :  { %1635 = vst [vmem:[#allocation2 + $0x58] sm:$0xff] %v1548_v41   ;;  %v983_v49 = vmul.f32 %v2061_v47, %v944_v15  ;;  %v1228_v23 = vmul.f32 %v1177_v18, %v1074_v22  ;;  %v2327_v14 = vpop.permute.xlu0 %1171  ;;  %v1014_v58 = vadd.f32 %v2067_v50, %v992_v1  ;;  %v1057_v55 = vmul.f32 %v2081_v56, %v1013_v42 }
  0xef   :  { %v359_v28 = vadd.f32 %v2067_v50, %v324_v57  ;;  %v439_v29 = vmul.f32 %v2081_v56, %v372_v33  ;;  %vm404_vm13 = vcmp.ge.f32.partialorder %v372_v33, 0.0  ;;  %v1212_v40 = vpop.permute.xlu2 %1211 }
  0xf0   :  { %v1005_v34 = vadd.f32 %v2067_v50, %v983_v49  ;;  %v1608_v43 = vpack.c.bf16 %v1229_v30, %v1228_v23  ;;  %v1058_v22 = vmul.f32 %v2081_v56, %v1014_v58  ;;  %vm1036_vm0 = vcmp.ge.f32.partialorder %v1014_v58, 0.0 }
  0xf1   :  { %vm391_vm11 = vcmp.ge.f32.partialorder %v359_v28, 0.0  ;;  %v426_v51 = vmul.f32 %v2081_v56, %v359_v28  ;;  %v471_v30 = vsel %vm404_vm13, %v372_v33, %v439_v29  ;;  %v1232_v23 = vmul.f32 %v1197_v60, %v1078_v16 }
  0xf2   :  { %vm1027_vm12 = vcmp.ge.f32.partialorder %v1005_v34, 0.0  ;;  %v1049_v10 = vmul.f32 %v2081_v56, %v1005_v34  ;;  %1647 = vst [vmem:[#allocation2 + $0xb8] sm:$0xff] %v1608_v43   ;;  %v292_v61 = vpop.f32.mrf.mxu2  ;;  %v695_v54 = vmul.f32 %v2138_v24, %v471_v30  ;;  %v1080_v20 = vsel %vm1036_vm0, %v1014_v58, %v1058_v22 }
  0xf3   :  { %v458_v36 = vsel %vm391_vm11, %v359_v28, %v426_v51  ;;  %v338_v7 = vmul.f32 %v2061_v47, %v292_v61  ;;  %v969_v38 = vpop.f32.mrf.mxu3 }
  0xf4   :  { %v682_v59 = vmul.f32 %v2005_v25, %v458_v36  ;;  %v1071_v5 = vsel %vm1027_vm12, %v1005_v34, %v1049_v10  ;;  %v993_v13 = vmul.f32 %v2061_v47, %v969_v38  ;;  %v260_v32 = vpop.f32.mrf.mxu0  ;;  %v1079_v34 = vsel %vm1035_vm1, %v1013_v42, %v1057_v55 }
  0xf5   :  { %v1225_v44 = vmul.f32 %v2297_v62, %v1071_v5  ;;  %v373_v2 = vadd.f32 %v2067_v50, %v338_v7  ;;  %v325_v3 = vmul.f32 %v2061_v47, %v260_v32  ;;  %v947_v45 = vpop.f32.mrf.mxu1  ;;  %v1192_v27 = vpop.permute.xlu1 %1191 }
  0xf6   :  { %v1518_v4 = vpack.c.bf16 %v682_v59, %v681_v37  ;;  %v1015_v8 = vadd.f32 %v2067_v50, %v993_v13  ;;  %v984_v0 = vmul.f32 %v2061_v47, %v947_v45  ;;  %v1231_v25 = vmul.f32 %v1192_v27, %v1077_v31  ;;  %v1187_v11 = vpop.permute.xlu0 %1186 }
  0xf7   :  { %v1598_v12 = vpack.c.bf16 %v1225_v44, %v1224_v19  ;;  %vm405_vm14 = vcmp.ge.f32.partialorder %v373_v2, 0.0  ;;  %v440_v62 = vmul.f32 %v2081_v56, %v373_v2  ;;  %v1230_v63 = vmul.f32 %v1187_v11, %v1076_v21 }
  0xf8   :  { %1629 = vst [vmem:[#allocation2 + $0x28] sm:$0xff] %v1518_v4   ;;  %vm1037_vm15 = vcmp.ge.f32.partialorder %v1015_v8, 0.0  ;;  %v1059_v26 = vmul.f32 %v2081_v56, %v1015_v8  ;;  %v360_v35 = vadd.f32 %v2067_v50, %v325_v3  ;;  %v1006_v1 = vadd.f32 %v2067_v50, %v984_v0 }
  0xf9   :  { %1645 = vst [vmem:[#allocation2 + $0xa8] sm:$0xff] %v1598_v12   ;;  %v472_v41 = vsel %vm405_vm14, %v373_v2, %v440_v62  ;;  %v1613_v57 = vpack.c.bf16 %v1231_v25, %v1230_v63 }
  0xfa   :  { %v696_v46 = vmul.f32 %v2134_v17, %v472_v41  ;;  %v295_v15 = vpop.f32.mrf.mxu2  ;;  %v1081_v49 = vsel %vm1037_vm15, %v1015_v8, %v1059_v26  ;;  %vm392_vm2 = vcmp.ge.f32.partialorder %v360_v35, 0.0  ;;  %v427_v21 = vmul.f32 %v2081_v56, %v360_v35 }
  0xfb   :  { %v339_v18 = vmul.f32 %v2061_v47, %v295_v15  ;;  %1648 = vst [vmem:[#allocation2 + $0xc0] sm:$0xff] %v1613_v57   ;;  %v1050_v43 = vmul.f32 %v2081_v56, %v1006_v1  ;;  %v1235_v16 = vmul.f32 %v1212_v40, %v1081_v49  ;;  %vm1028_vm3 = vcmp.ge.f32.partialorder %v1006_v1, 0.0 }
  0xfc   :  { %v1553_v33 = vpack.c.bf16 %v696_v46, %v695_v54  ;;  %v262_v28 = vpop.f32.mrf.mxu0  ;;  %v459_v29 = vsel %vm392_vm2, %v360_v35, %v427_v21 }
  0xfd   :  { %v326_v24 = vmul.f32 %v2061_v47, %v262_v28  ;;  %v949_v17 = vpop.f32.mrf.mxu1  ;;  %v1207_v39 = vpop.permute.xlu1 %1206  ;;  %v374_v60 = vadd.f32 %v2067_v50, %v339_v18  ;;  %v1072_v7 = vsel %vm1028_vm3, %v1006_v1, %v1050_v43  ;;  %v683_v44 = vmul.f32 %v2073_v53, %v459_v29 }
  0xfe   :  { %1636 = vst [vmem:[#allocation2 + $0x60] sm:$0xff] %v1553_v33   ;;  %v985_v31 = vmul.f32 %v2061_v47, %v949_v17  ;;  %v1234_v58 = vmul.f32 %v1207_v39, %v1080_v20  ;;  %v1202_v51 = vpop.permute.xlu0 %1201  ;;  %v1226_v45 = vmul.f32 %v2271_v48, %v1072_v7 }
  0xff   :  { %v361_v37 = vadd.f32 %v2067_v50, %v326_v24  ;;  %v1233_v10 = vmul.f32 %v1202_v51, %v1079_v34  ;;  %v441_v5 = vmul.f32 %v2081_v56, %v374_v60  ;;  %vm406_vm6 = vcmp.ge.f32.partialorder %v374_v60, 0.0 }
 0x100   :  { %v1007_v61 = vadd.f32 %v2067_v50, %v985_v31  ;;  %v1623_v19 = vpack.c.bf16 %v1235_v16, %v1234_v58 }
 0x101   :  { %vm393_vm4 = vcmp.ge.f32.partialorder %v361_v37, 0.0  ;;  %v428_v42 = vmul.f32 %v2081_v56, %v361_v37  ;;  %v1618_v36 = vpack.c.bf16 %v1233_v10, %v1232_v23  ;;  %v473_v8 = vsel %vm406_vm6, %v374_v60, %v441_v5 }
 0x102   :  { %vm1029_vm5 = vcmp.ge.f32.partialorder %v1007_v61, 0.0  ;;  %v1051_v38 = vmul.f32 %v2081_v56, %v1007_v61  ;;  %1650 = vst [vmem:[#allocation2 + $0xd0] sm:$0xff] %v1623_v19   ;;  %v297_v59 = vpop.f32.mrf.mxu2 }
 0x103   :  { %v460_v13 = vsel %vm393_vm4, %v361_v37, %v428_v42  ;;  %1649 = vst [vmem:[#allocation2 + $0xc8] sm:$0xff] %v1618_v36   ;;  %v340_v32 = vmul.f32 %v2061_v47, %v297_v59 }
 0x104   :  { %v684_v2 = vmul.f32 %v2071_v52, %v460_v13  ;;  %v1073_v3 = vsel %vm1029_vm5, %v1007_v61, %v1051_v38  ;;  %v697_v52 = vmul.f32 %v2093_v6, %v473_v8 }
 0x105   :  { %v1227_v27 = vmul.f32 %v2327_v14, %v1073_v3  ;;  %v375_v22 = vadd.f32 %v2067_v50, %v340_v32 }
 0x106   :  { %v1523_v4 = vpack.c.bf16 %v684_v2, %v683_v44 }
 0x107   :  { %v1603_v0 = vpack.c.bf16 %v1227_v27, %v1226_v45  ;;  %vm407_vm7 = vcmp.ge.f32.partialorder %v375_v22, 0.0  ;;  %v442_v25 = vmul.f32 %v2081_v56, %v375_v22 }
 0x108   :  { %1630 = vst [vmem:[#allocation2 + $0x30] sm:$0xff] %v1523_v4  }
 0x109   :  { %1646 = vst [vmem:[#allocation2 + $0xb0] sm:$0xff] %v1603_v0   ;;  %v474_v47 = vsel %vm407_vm7, %v375_v22, %v442_v25 }
 0x10a   :  { %v698_v53 = vmul.f32 %v2163_v9, %v474_v47 }
 0x10c   :  { %v1558_v50 = vpack.c.bf16 %v698_v53, %v697_v52 }
 0x10e   :  { %1637 = vst [vmem:[#allocation2 + $0x68] sm:$0xff] %v1558_v50  }
 0x10f   :  { %1292 = dma.vmem_to_hbm [thread:$0]  %s1285_s5, 3456, %s1287_s30, [#allocation3], %s1701_s7, %s1701_s7, %s1702_s8  }
 0x110   :  { %1697 = dma.done.wait [#allocation3], 3456  }
 0x111   :  { %1698 = vsyncadd [#allocation3], 4294963840 }
 0x112   :  { %1297 = vsyncpa [#allocation3], 1 }

</bundles_post_ra>
